<compile_context>
chip_gen: v7x
topology: tpu7x:2x2x1
jax: 0.10.0
libtpu: 0.0.40
codegen_flags: <defaults>
</compile_context>

<pallas_src>
import functools

import numpy as np
import jax
import jax.numpy as jnp
from jax.experimental import pallas as pl
from jax.experimental.pallas import tpu as pltpu


def _round_up(x, m):
    return ((x + m - 1) // m) * m


@functools.lru_cache(maxsize=None)
def _scale_table(n_seg):
    """Block-diagonal grouped scale matrix, 3-way bf16 split, (3, 24, 8*d_eff)."""
    d_eff = 3 * n_seg
    scales = np.linspace(-1.0, 1.0, n_seg, dtype=np.float32)
    cols = np.arange(d_eff)
    m_small = np.zeros((3, d_eff), dtype=np.float32)
    m_small[cols % 3, cols] = scales[cols // 3]          # m_small[c, 3s+c] = scales[s]
    m_big = np.zeros((24, 8 * d_eff), dtype=np.float32)  # 8 copies on the diagonal
    for j in range(8):
        m_big[3 * j:3 * j + 3, j * d_eff:(j + 1) * d_eff] = m_small
    m = jnp.asarray(m_big)
    m1 = m.astype(jnp.bfloat16)
    r1 = m - m1.astype(jnp.float32)
    m2 = r1.astype(jnp.bfloat16)
    m3 = (r1 - m2.astype(jnp.float32)).astype(jnp.bfloat16)
    return jnp.stack([m1, m2, m3])                        # (3, 24, 8*d_eff) bf16


def _d3_pos_enc_kernel(x_ref, m_ref, o_ref, *, g_in):
    """Grouped, lane-dense D3 positional encoding.

    x_ref: (tg, 24)        f32   x_ref[g, 3j+c] = x[8g+j, c] (rows past N are 0)
    m_ref: (3, 24, 8*d)    bf16  3-way bf16 split of the block-diag scale matrix
    o_ref: (tg, 8*d)       f32   o_ref[g, d*j+k] = out[8g+j, k]
    g_in : number of real (non-padding) input row-groups.
    """
    tg = o_ref.shape[0]
    g0 = pl.program_id(0) * tg

    def scaled():
        # 3x3 bf16 splitting -> 6 tiny MXU matmuls (K=24).  MXU slot is idle in
        # this mem-bound kernel, and the result matches the f32 elementwise
        # product to ~1 ulp (no bf16 truncation error visible at 1e-6 rtol).
        x = x_ref[...]
        x1 = x.astype(jnp.bfloat16)
        r = x - x1.astype(jnp.float32)
        x2 = r.astype(jnp.bfloat16)
        x3 = (r - x2.astype(jnp.float32)).astype(jnp.bfloat16)
        m1, m2, m3 = m_ref[0], m_ref[1], m_ref[2]
        acc = jnp.dot(x1, m3, preferred_element_type=jnp.float32)
        acc = acc + jnp.dot(x2, m2, preferred_element_type=jnp.float32)
        acc = acc + jnp.dot(x3, m1, preferred_element_type=jnp.float32)
        acc = acc + jnp.dot(x1, m2, preferred_element_type=jnp.float32)
        acc = acc + jnp.dot(x2, m1, preferred_element_type=jnp.float32)
        acc = acc + jnp.dot(x1, m1, preferred_element_type=jnp.float32)
        return acc

    @pl.when(g0 + tg <= g_in)            # interior block: dense store, no mask
    def _():
        o_ref[...] = scaled()

    @pl.when(jnp.logical_and(g0 < g_in, g0 + tg > g_in))   # single boundary block
    def _():
        grp = jax.lax.broadcasted_iota(jnp.int32, (tg, 1), 0) + g0
        o_ref[...] = jnp.where(grp < g_in, scaled(), 0.0)

    @pl.when(g0 >= g_in)                 # pure-padding block: skip compute
    def _():
        o_ref[...] = jnp.zeros_like(o_ref)


def d3_positional_encoder(x, d_model=48, n_padding=0, *, block_rows=8192,
                          small_n_threshold=4096):
    """Pallas implementation of D3PositionalEncoder.forward.

    block_rows: output rows per grid step (rounded up to a multiple of 64).
      With the grouped layout a step uses ~block_rows/2 KiB of double-buffered
      VMEM (~4 MiB at 8192), safe on v5e's 16 MiB scoped default; v6e/v7x can
      use 16384-32768.
    small_n_threshold: below this many output rows a fused jnp path is used
      (the pallas_call is pure fixed overhead at the module's N=8 use case).
    Note: output dtype is float32 regardless of input dtype (torch preserves
    the input dtype); callers of this module pass f32 xyz coordinates.
    """
    assert x.shape[1] == 3
    n = int(x.shape[0])
    n_seg = d_model // 3
    d_eff = 3 * n_seg                    # torch's [:, :d_model] keeps all 3*nSeg cols
    n_out = n + n_padding + 1            # ConstantPad1d((0, n_padding + 1), 0)

    if n == 0 or d_eff == 0:
        return jnp.zeros((n_out, d_eff), dtype=jnp.float32)

    x32 = x.astype(jnp.float32)

    if n_out < small_n_threshold:        # small-N fast path: fused XLA elementwise
        scales = jnp.asarray(np.linspace(-1.0, 1.0, n_seg, dtype=np.float32))
        xs = (x32[:, None, :] * scales[None, :, None]).reshape(n, d_eff)
        return jnp.pad(xs, ((0, n_padding + 1), (0, 0)))

    d8 = 8 * d_eff
    n_pad8 = _round_up(n_out, 8)
    g_out = n_pad8 // 8                  # output row-groups (incl. padding groups)
    nx8 = _round_up(n, 8)
    g_in = nx8 // 8                      # real input row-groups

    if nx8 != n:                         # zero rows inside the last real group
        x32 = jnp.pad(x32, ((0, nx8 - n), (0, 0)))
    x_g = x32.reshape(g_in, 24)          # lane-dense grouped input (free reshape)

    m_split = _scale_table(n_seg)        # (3, 24, d8) bf16 constant

    block_rows = max(64, _round_up(int(block_rows), 64))
    tg = min(block_rows // 8, _round_up(g_out, 8))
    if g_out >= 16 and pl.cdiv(g_out, tg) < 2:
        # v7x has 2 TensorCores: make sure the "parallel" axis has >=2 steps.
        tg = _round_up(pl.cdiv(g_out, 2), 8)
    grid = pl.cdiv(g_out, tg)
    last_in_block = max(pl.cdiv(g_in, tg) - 1, 0)

    kernel = functools.partial(_d3_pos_enc_kernel, g_in=g_in)

    out_g = pl.pallas_call(
        kernel,
        out_shape=jax.ShapeDtypeStruct((g_out, d8), jnp.float32),
        grid_spec=pltpu.PrefetchScalarGridSpec(
            num_scalar_prefetch=0,
            grid=(grid,),
            in_specs=[
                # Padding-only grid steps clamp onto the last real input block
                # (their compute is skipped and the output is written as zeros).
                pl.BlockSpec((tg, 24), lambda i: (jnp.minimum(i, last_in_block), 0)),
                pl.BlockSpec((3, 24, d8), lambda i: (0, 0, 0)),
            ],
            out_specs=pl.BlockSpec((tg, d8), lambda i: (i, 0)),
        ),
        compiler_params=pltpu.CompilerParams(
            dimension_semantics=("parallel",),
        ),
    )(x_g, m_split)

    out = out_g.reshape(n_pad8, d_eff)   # free: contiguous row-major regroup
    if n_pad8 != n_out:
        out = out[:n_out]                # drop the <=7 alignment rows
    return out


def _numpy_reference(x, d_model, n_padding):
    x = np.asarray(x, dtype=np.float32)
    n_seg = d_model // 3
    scales = np.linspace(-1.0, 1.0, n_seg, dtype=np.float32)
    xs = np.concatenate([x * sc for sc in scales], axis=1)[:, :d_model]
    out = np.zeros((x.shape[0] + n_padding + 1, xs.shape[1]), dtype=np.float32)
    out[: x.shape[0], :] = xs
    return out


if __name__ == "__main__":
    key = jax.random.PRNGKey(0)
    d_model = 48

    # 1) Module's primary small case (N=8 xyz points) -- jnp fast path.
    x = jax.random.normal(key, (8, 3), dtype=jnp.float32)
    out = jax.block_until_ready(d3_positional_encoder(x, d_model, 0))
    ref = _numpy_reference(np.asarray(x), d_model, 0)
    assert out.shape == ref.shape, (out.shape, ref.shape)
    np.testing.assert_allclose(np.asarray(out), ref, rtol=2e-6, atol=2e-6)

    # 2) Same small case forced through the Pallas kernel (boundary-mask path,
    #    partial output block, output row-slice).
    out2 = jax.block_until_ready(
        d3_positional_encoder(x, d_model, 0, block_rows=64, small_n_threshold=0))
    assert out2.shape == ref.shape, (out2.shape, ref.shape)
    np.testing.assert_allclose(np.asarray(out2), ref, rtol=2e-6, atol=2e-6)

    # 3) Multi-block case: interior + boundary + pure-padding blocks, clamped
    #    input index_map, partial final output block.
    x3 = jax.random.normal(jax.random.PRNGKey(0), (100, 3), dtype=jnp.float32)
    out3 = jax.block_until_ready(
        d3_positional_encoder(x3, d_model, 30, block_rows=64, small_n_threshold=0))
    ref3 = _numpy_reference(np.asarray(x3), d_model, 30)
    assert out3.shape == ref3.shape, (out3.shape, ref3.shape)
    np.testing.assert_allclose(np.asarray(out3), ref3, rtol=2e-6, atol=2e-6)

    print("KERNEL_OK")
</pallas_src>

<mosaic_0001>
module attributes {stable_mosaic.version = 11 : i64} {
  func.func @_d3_pos_enc_kernel(%arg0: i32, %arg1: memref<8x24xf32, #tpu.memory_space<vmem>>, %arg2: memref<3x24x384xbf16, #tpu.memory_space<vmem>>, %arg3: memref<8x384xf32, #tpu.memory_space<vmem>>) attributes {dimension_semantics = [#tpu.dimension_semantics<parallel>], iteration_bounds = array<i64: 1>, scalar_prefetch = 0 : i64, scratch_operands = 0 : i64, tpu.core_type = #tpu.core_type<tc>, window_params = [{transform_indices = @transform_0, window_bounds = array<i64: 8, 24>}, {pipeline_mode = #tpu.pipeline_mode<synchronous>, transform_indices = @transform_1, window_bounds = array<i64: 3, 24, 384>}, {transform_indices = @transform_2, window_bounds = array<i64: 8, 384>}]} {
    %c8_i32 = arith.constant 8 : i32
    %0 = arith.muli %arg0, %c8_i32 : i32
    %c8_i32_0 = arith.constant 8 : i32
    %1 = arith.addi %0, %c8_i32_0 : i32
    %c1_i32 = arith.constant 1 : i32
    %2 = arith.cmpi sle, %1, %c1_i32 : i32
    %3 = arith.extui %2 : i1 to i32
    %c0_i32 = arith.constant 0 : i32
    %4 = arith.cmpi ne, %3, %c0_i32 : i32
    scf.if %4 {
      %c0 = arith.constant 0 : index
      %c0_7 = arith.constant 0 : index
      %14 = vector.load %arg1[%c0, %c0_7] : memref<8x24xf32, #tpu.memory_space<vmem>>, vector<8x24xf32>
      %15 = arith.truncf %14 : vector<8x24xf32> to vector<8x24xbf16>
      %16 = arith.extf %15 : vector<8x24xbf16> to vector<8x24xf32>
      %17 = arith.subf %14, %16 : vector<8x24xf32>
      %18 = arith.truncf %17 : vector<8x24xf32> to vector<8x24xbf16>
      %19 = arith.extf %18 : vector<8x24xbf16> to vector<8x24xf32>
      %20 = arith.subf %17, %19 : vector<8x24xf32>
      %21 = arith.truncf %20 : vector<8x24xf32> to vector<8x24xbf16>
      %c0_8 = arith.constant 0 : index
      %c0_9 = arith.constant 0 : index
      %c0_10 = arith.constant 0 : index
      %22 = vector.load %arg2[%c0_8, %c0_9, %c0_10] : memref<3x24x384xbf16, #tpu.memory_space<vmem>>, vector<1x24x384xbf16>
      %23 = vector.shape_cast %22 : vector<1x24x384xbf16> to vector<24x384xbf16>
      %c1 = arith.constant 1 : index
      %c0_11 = arith.constant 0 : index
      %c0_12 = arith.constant 0 : index
      %24 = vector.load %arg2[%c1, %c0_11, %c0_12] : memref<3x24x384xbf16, #tpu.memory_space<vmem>>, vector<1x24x384xbf16>
      %25 = vector.shape_cast %24 : vector<1x24x384xbf16> to vector<24x384xbf16>
      %c2 = arith.constant 2 : index
      %c0_13 = arith.constant 0 : index
      %c0_14 = arith.constant 0 : index
      %26 = vector.load %arg2[%c2, %c0_13, %c0_14] : memref<3x24x384xbf16, #tpu.memory_space<vmem>>, vector<1x24x384xbf16>
      %27 = vector.shape_cast %26 : vector<1x24x384xbf16> to vector<24x384xbf16>
      %cst = arith.constant dense<0.000000e+00> : vector<8x384xf32>
      %28 = tpu.matmul %15, %27, %cst {dimension_numbers = #tpu.dot_dimension_numbers<[1], [0], [0], [1], [0, 0, 1, 1], [], []>} : vector<8x24xbf16>, vector<24x384xbf16>, vector<8x384xf32> -> vector<8x384xf32>
      %cst_15 = arith.constant dense<0.000000e+00> : vector<8x384xf32>
      %29 = tpu.matmul %18, %25, %cst_15 {dimension_numbers = #tpu.dot_dimension_numbers<[1], [0], [0], [1], [0, 0, 1, 1], [], []>} : vector<8x24xbf16>, vector<24x384xbf16>, vector<8x384xf32> -> vector<8x384xf32>
      %30 = arith.addf %28, %29 : vector<8x384xf32>
      %cst_16 = arith.constant dense<0.000000e+00> : vector<8x384xf32>
      %31 = tpu.matmul %21, %23, %cst_16 {dimension_numbers = #tpu.dot_dimension_numbers<[1], [0], [0], [1], [0, 0, 1, 1], [], []>} : vector<8x24xbf16>, vector<24x384xbf16>, vector<8x384xf32> -> vector<8x384xf32>
      %32 = arith.addf %30, %31 : vector<8x384xf32>
      %cst_17 = arith.constant dense<0.000000e+00> : vector<8x384xf32>
      %33 = tpu.matmul %15, %25, %cst_17 {dimension_numbers = #tpu.dot_dimension_numbers<[1], [0], [0], [1], [0, 0, 1, 1], [], []>} : vector<8x24xbf16>, vector<24x384xbf16>, vector<8x384xf32> -> vector<8x384xf32>
      %34 = arith.addf %32, %33 : vector<8x384xf32>
      %cst_18 = arith.constant dense<0.000000e+00> : vector<8x384xf32>
      %35 = tpu.matmul %18, %23, %cst_18 {dimension_numbers = #tpu.dot_dimension_numbers<[1], [0], [0], [1], [0, 0, 1, 1], [], []>} : vector<8x24xbf16>, vector<24x384xbf16>, vector<8x384xf32> -> vector<8x384xf32>
      %36 = arith.addf %34, %35 : vector<8x384xf32>
      %cst_19 = arith.constant dense<0.000000e+00> : vector<8x384xf32>
      %37 = tpu.matmul %15, %23, %cst_19 {dimension_numbers = #tpu.dot_dimension_numbers<[1], [0], [0], [1], [0, 0, 1, 1], [], []>} : vector<8x24xbf16>, vector<24x384xbf16>, vector<8x384xf32> -> vector<8x384xf32>
      %38 = arith.addf %36, %37 : vector<8x384xf32>
      %c0_20 = arith.constant 0 : index
      %c0_21 = arith.constant 0 : index
      %39 = vector.load %arg3[%c0_20, %c0_21] : memref<8x384xf32, #tpu.memory_space<vmem>>, vector<8x384xf32>
      tpu.vector_store %arg3[%c0_20, %c0_21], %38 {strides = array<i32>} : memref<8x384xf32, #tpu.memory_space<vmem>>, vector<8x384xf32>,
    } else {
    }
    %c1_i32_1 = arith.constant 1 : i32
    %5 = arith.cmpi slt, %0, %c1_i32_1 : i32
    %c8_i32_2 = arith.constant 8 : i32
    %6 = arith.addi %0, %c8_i32_2 : i32
    %c1_i32_3 = arith.constant 1 : i32
    %7 = arith.cmpi sgt, %6, %c1_i32_3 : i32
    %8 = arith.andi %5, %7 : i1
    %9 = arith.extui %8 : i1 to i32
    %c0_i32_4 = arith.constant 0 : i32
    %10 = arith.cmpi ne, %9, %c0_i32_4 : i32
    scf.if %10 {
      %14 = tpu.iota {dimensions = array<i32: 0>} : vector<8x1xi32>
      %15 = vector.broadcast %0 : i32 to vector<8x1xi32>
      %16 = arith.addi %14, %15 : vector<8x1xi32>
      %c1_i32_7 = arith.constant 1 : i32
      %17 = vector.broadcast %c1_i32_7 : i32 to vector<8x1xi32>
      %18 = arith.cmpi slt, %16, %17 : vector<8x1xi32>
      %c0 = arith.constant 0 : index
      %c0_8 = arith.constant 0 : index
      %19 = vector.load %arg1[%c0, %c0_8] : memref<8x24xf32, #tpu.memory_space<vmem>>, vector<8x24xf32>
      %20 = arith.truncf %19 : vector<8x24xf32> to vector<8x24xbf16>
      %21 = arith.extf %20 : vector<8x24xbf16> to vector<8x24xf32>
      %22 = arith.subf %19, %21 : vector<8x24xf32>
      %23 = arith.truncf %22 : vector<8x24xf32> to vector<8x24xbf16>
      %24 = arith.extf %23 : vector<8x24xbf16> to vector<8x24xf32>
      %25 = arith.subf %22, %24 : vector<8x24xf32>
      %26 = arith.truncf %25 : vector<8x24xf32> to vector<8x24xbf16>
      %c0_9 = arith.constant 0 : index
      %c0_10 = arith.constant 0 : index
      %c0_11 = arith.constant 0 : index
      %27 = vector.load %arg2[%c0_9, %c0_10, %c0_11] : memref<3x24x384xbf16, #tpu.memory_space<vmem>>, vector<1x24x384xbf16>
      %28 = vector.shape_cast %27 : vector<1x24x384xbf16> to vector<24x384xbf16>
      %c1 = arith.constant 1 : index
      %c0_12 = arith.constant 0 : index
      %c0_13 = arith.constant 0 : index
      %29 = vector.load %arg2[%c1, %c0_12, %c0_13] : memref<3x24x384xbf16, #tpu.memory_space<vmem>>, vector<1x24x384xbf16>
      %30 = vector.shape_cast %29 : vector<1x24x384xbf16> to vector<24x384xbf16>
      %c2 = arith.constant 2 : index
      %c0_14 = arith.constant 0 : index
      %c0_15 = arith.constant 0 : index
      %31 = vector.load %arg2[%c2, %c0_14, %c0_15] : memref<3x24x384xbf16, #tpu.memory_space<vmem>>, vector<1x24x384xbf16>
      %32 = vector.shape_cast %31 : vector<1x24x384xbf16> to vector<24x384xbf16>
      %cst = arith.constant dense<0.000000e+00> : vector<8x384xf32>
      %33 = tpu.matmul %20, %32, %cst {dimension_numbers = #tpu.dot_dimension_numbers<[1], [0], [0], [1], [0, 0, 1, 1], [], []>} : vector<8x24xbf16>, vector<24x384xbf16>, vector<8x384xf32> -> vector<8x384xf32>
      %cst_16 = arith.constant dense<0.000000e+00> : vector<8x384xf32>
      %34 = tpu.matmul %23, %30, %cst_16 {dimension_numbers = #tpu.dot_dimension_numbers<[1], [0], [0], [1], [0, 0, 1, 1], [], []>} : vector<8x24xbf16>, vector<24x384xbf16>, vector<8x384xf32> -> vector<8x384xf32>
      %35 = arith.addf %33, %34 : vector<8x384xf32>
      %cst_17 = arith.constant dense<0.000000e+00> : vector<8x384xf32>
      %36 = tpu.matmul %26, %28, %cst_17 {dimension_numbers = #tpu.dot_dimension_numbers<[1], [0], [0], [1], [0, 0, 1, 1], [], []>} : vector<8x24xbf16>, vector<24x384xbf16>, vector<8x384xf32> -> vector<8x384xf32>
      %37 = arith.addf %35, %36 : vector<8x384xf32>
      %cst_18 = arith.constant dense<0.000000e+00> : vector<8x384xf32>
      %38 = tpu.matmul %20, %30, %cst_18 {dimension_numbers = #tpu.dot_dimension_numbers<[1], [0], [0], [1], [0, 0, 1, 1], [], []>} : vector<8x24xbf16>, vector<24x384xbf16>, vector<8x384xf32> -> vector<8x384xf32>
      %39 = arith.addf %37, %38 : vector<8x384xf32>
      %cst_19 = arith.constant dense<0.000000e+00> : vector<8x384xf32>
      %40 = tpu.matmul %23, %28, %cst_19 {dimension_numbers = #tpu.dot_dimension_numbers<[1], [0], [0], [1], [0, 0, 1, 1], [], []>} : vector<8x24xbf16>, vector<24x384xbf16>, vector<8x384xf32> -> vector<8x384xf32>
      %41 = arith.addf %39, %40 : vector<8x384xf32>
      %cst_20 = arith.constant dense<0.000000e+00> : vector<8x384xf32>
      %42 = tpu.matmul %20, %28, %cst_20 {dimension_numbers = #tpu.dot_dimension_numbers<[1], [0], [0], [1], [0, 0, 1, 1], [], []>} : vector<8x24xbf16>, vector<24x384xbf16>, vector<8x384xf32> -> vector<8x384xf32>
      %43 = arith.addf %41, %42 : vector<8x384xf32>
      %cst_21 = arith.constant 0.000000e+00 : f32
      %44 = vector.shape_cast %18 : vector<8x1xi1> to vector<8x1xi1>
      %45 = vector.broadcast %44 : vector<8x1xi1> to vector<8x384xi1>
      %46 = vector.broadcast %cst_21 : f32 to vector<8x384xf32>
      %47 = arith.select %45, %43, %46 : vector<8x384xi1>, vector<8x384xf32>
      %c0_22 = arith.constant 0 : index
      %c0_23 = arith.constant 0 : index
      %48 = vector.load %arg3[%c0_22, %c0_23] : memref<8x384xf32, #tpu.memory_space<vmem>>, vector<8x384xf32>
      tpu.vector_store %arg3[%c0_22, %c0_23], %47 {strides = array<i32>} : memref<8x384xf32, #tpu.memory_space<vmem>>, vector<8x384xf32>,
    } else {
    }
    %c1_i32_5 = arith.constant 1 : i32
    %11 = arith.cmpi sge, %0, %c1_i32_5 : i32
    %12 = arith.extui %11 : i1 to i32
    %c0_i32_6 = arith.constant 0 : i32
    %13 = arith.cmpi ne, %12, %c0_i32_6 : i32
    scf.if %13 {
      %cst = arith.constant 0.000000e+00 : f32
      %14 = vector.broadcast %cst : f32 to vector<8x384xf32>
      %c0 = arith.constant 0 : index
      %c0_7 = arith.constant 0 : index
      %15 = vector.load %arg3[%c0, %c0_7] : memref<8x384xf32, #tpu.memory_space<vmem>>, vector<8x384xf32>
      tpu.vector_store %arg3[%c0, %c0_7], %14 {strides = array<i32>} : memref<8x384xf32, #tpu.memory_space<vmem>>, vector<8x384xf32>,
    } else {
    }
    return
  }
  func.func @transform_0(%arg0: i32) -> (i32, i32) {
    %c0_i32 = arith.constant 0 : i32
    %0 = arith.minsi %arg0, %c0_i32 : i32
    %c0_i32_0 = arith.constant 0 : i32
    %c0_i32_1 = arith.constant 0 : i32
    return %0, %c0_i32_0 : i32, i32
  }
  func.func @transform_1(%arg0: i32) -> (i32, i32, i32) {
    %c0_i32 = arith.constant 0 : i32
    %c0_i32_0 = arith.constant 0 : i32
    %c0_i32_1 = arith.constant 0 : i32
    %c0_i32_2 = arith.constant 0 : i32
    return %c0_i32, %c0_i32_0, %c0_i32_1 : i32, i32, i32
  }
  func.func @transform_2(%arg0: i32) -> (i32, i32) {
    %c0_i32 = arith.constant 0 : i32
    %c0_i32_0 = arith.constant 0 : i32
    return %arg0, %c0_i32 : i32, i32
  }
}

</mosaic_0001>

<bundles_post_ra>
// kernel: tpu_custom_call.1
= control target key start
LH: loop header
LB: loop body
LE: loop exit
PB: predicated region body
PF: predicated region fallthrough
CT: control target
= control target key end

     0   :  { %7 = vsyncpa [#allocation3], 0  ;;  %s1887_s0 = inlined_call_operand.hbm [shape: f32[1,24], index: 0, kind: input, shape index: {}]   ;;  %s1888_s1 = inlined_call_operand.hbm [shape: bf16[3,24,384], index: 1, kind: input, shape index: {}]   ;;  %s1889_s2 = inlined_call_operand.hbm [shape: f32[2,384], index: 2, kind: output, shape index: {}]  }
   0x1   :  { %8 = vsyncpa [#allocation6], 0 }
   0x2   :  { %9 = vsyncpa [#allocation4], 0 }
   0x3   :  { %14 = vsyncadd [#allocation3], 112  ;;  %s1737_s9 = smov [#allocation2]   ;;  %s1665_s13 = scalar_lea.hbm %s1887_s0, 16 }
   0x4   :  { %s15_s10 = sshll.u32 %s1737_s9, 4  ;;  %p1666_p0 = scmp.ne.s32.totalorder %s1887_s0, %s1665_s13  ;;  %s16_s10 = int_to_ptr.vmem [resolvable:$true] %s15_s10 }
   0x5   :  { %p1669_p1 = scmp.lt.u32.totalorder %s1665_s13, %s1887_s0 }
   0x7   :  { %p1671_p2 = pnand %p1669_p1, %p1666_p0 }
   0x9   :  { %1674 = shalt.err (!%p1671_p2)
}
   0xa   :  { %s1675_s18 = scalar_lea.vmem %s16_s10, 16  ;;  %s1679_s19 = scalar_lea.vmem %s16_s10, 128 }
   0xb   :  { %p1676_p3 = scmp.ne.s32.totalorder %s16_s10, %s1675_s18  ;;  %p1680_p4 = scmp.lt.s32.totalorder %s16_s10, %s16_s10 }
   0xc   :  { %p1681_p5 = scmp.lt.s32.totalorder %s1679_s19, %s1675_s18 }
   0xe   :  { %p1682_p6 = por %p1681_p5, %p1680_p4 }
  0x10   :  { %p1683_p7 = pnand %p1682_p6, %p1676_p3 }
  0x12   :  { %1686 = shalt.err (!%p1683_p7)
}
  0x13   :  { %s1738_s20 = smov 16   ;;  %s1739_s21 = smov 1  }
  0x14   :  { %21 = dma.hbm_to_vmem [thread:$0]  %s1887_s0, 16, %s16_s10, [#allocation3], %s1738_s20, %s1738_s20, %s1739_s21  }
  0x15   :  { %s1740_s24 = smov [#allocation5]   ;;  %s1687_s28 = scalar_lea.hbm %s1888_s1, 1728 }
  0x16   :  { %s27_s25 = sshll.u32 %s1740_s24, 4  ;;  %p1688_p8 = scmp.ne.s32.totalorder %s1888_s1, %s1687_s28  ;;  %s28_s25 = int_to_ptr.vmem [resolvable:$true] %s27_s25 }
  0x17   :  { %p1691_p9 = scmp.lt.u32.totalorder %s1687_s28, %s1888_s1 }
  0x19   :  { %p1693_p10 = pnand %p1691_p9, %p1688_p8 }
  0x1b   :  { %1696 = shalt.err (!%p1693_p10)
}
  0x1c   :  { %s1697_s5 = scalar_lea.vmem %s28_s25, 1728  ;;  %p1702_p12 = scmp.lt.s32.totalorder %s28_s25, %s28_s25 }
  0x1d   :  { %p1698_p11 = scmp.ne.s32.totalorder %s28_s25, %s1697_s5  ;;  %p1703_p13 = scmp.lt.s32.totalorder %s1697_s5, %s1697_s5 }
  0x1f   :  { %p1704_p0 = por %p1703_p13, %p1702_p12 }
  0x21   :  { %p1705_p1 = pnand %p1704_p0, %p1698_p11 }
  0x23   :  { %1708 = shalt.err (!%p1705_p1)
}
  0x24   :  { %s1741_s0 = smov 192   ;;  %s1742_s6 = smov 12  }
  0x25   :  { %33 = dma.hbm_to_vmem [thread:$0]  %s1888_s1, 1728, %s28_s25, [#allocation6], %s1741_s0, %s1741_s0, %s1742_s6  }
  0x26   :  { %1731 = dma.done.wait [#allocation3], 128  }
  0x27   :  { %1732 = vsyncadd [#allocation3], 4294967168 }
  0x28   :  { %1733 = dma.done.wait [#allocation6], 1728  }
  0x29   :  { %1734 = vsyncadd [#allocation6], 4294965568  ;;  %v1743_v0 = vmov 0.0   ;;  %vm1744_vm0 = vmmov 0   ;;  %v1745_v1 = vmov 0   ;;  %v759_v5 = vld [vmem:[#allocation5 + $0x3c] sm:$0xff]  ;;  %v735_v37 = vlaneseq }
  0x2a   :  { %1543 = vmatprep.subr.bf16.mxu1 %v1743_v0  ;;  %1547 = vmatprep.mubr.msk.bf16.mxu1 %vm1744_vm0, %v1743_v0  ;;  %v1793_v2 = vld [vmem:[#allocation5 + $0x28] ss:$12 sps:$4 sm:$0xff]   ;;  %v1795_v3 = vld [vmem:[#allocation5 + $0x2c] ss:$12 sps:$4 sm:$0xff]   ;;  %v1798_v4 = vld [vmem:[#allocation5 + $0x24] ss:$12 sps:$4 sm:$0xff]   ;;  %v1801_v6 = vcombine.high %v759_v5, %v759_v5  ;;  %v1492_v8 = vcombine.low %v759_v5, %v759_v5 }
  0x2b   :  { %838 = vmatprep.mubr.bf16.mxu0 %v1745_v1  ;;  %806 = vmatprep.subr.bf16.mxu0 %v1793_v2  ;;  %vm796_vm1 = vcmask 1043456   ;;  %v1649_v7 = vld [vmem:[#allocation5 + $0x44] ss:$0 sps:$4 sm:$0xff]   ;;  %v740_v9 = vld [vmem:[#allocation2] sm:$0xff]  ;;  %vm792_vm2 = vcmask 195584   ;;  %v736_v40 = vshrl.u32 %v735_v37, 7 }
  0x2c   :  { %1544 = vmatpush3.bf16.msra.mxu1 %v1795_v3  ;;  %807 = vmatpush1.bf16.msra.mxu0 %v1798_v4  ;;  %v1805_v10 = vpack.c.bf16 %v740_v9, %v740_v9  ;;  %v1653_v11 = vld [vmem:[#allocation5 + $0x4c] ss:$12 sps:$4 sm:$0xff]   ;;  %v804_v12 = vsel %vm796_vm1, %v1649_v7, 0  ;;  %v798_v13 = vsel %vm796_vm1, %v1492_v8, 0  ;;  %v766_v15 = vld [vmem:[#allocation5 + $0x60] sm:$0xff] }
  0x2d   :  { %1545 = vmatprep.subr.bf16.mxu1 %v1743_v0  ;;  %1495 = vmatprep.subr.msk.bf16.mxu0 %vm796_vm1, %v1801_v6  ;;  %v1651_v17 = vld [vmem:[#allocation5 + $0x48] ss:$12 sps:$4 sm:$0xff]   ;;  %v1654_v18 = vld [vmem:[#allocation5 + $0x50] ss:$12 sps:$4 sm:$0xff]   ;;  %v1502_v20 = vcombine.high %v766_v15, %v766_v15  ;;  %v1501_v21 = vcombine.low %v766_v15, %v766_v15  ;;  %v1658_v27 = vld [vmem:[#allocation5] ss:$12 sps:$4 sm:$0xff]  }
  0x2e   :  { %v742_v14 = vunpack.c.l.bf16 %v1805_v10  ;;  %v1657_v22 = vld [vmem:[#allocation5 + $0x68] ss:$0 sps:$4 sm:$0xff]   ;;  %v1660_v25 = vld [vmem:[#allocation5 + $0x4] ss:$12 sps:$4 sm:$0xff]   ;;  %v752_v26 = vld [vmem:[#allocation5 + $0x18] sm:$0xff]  ;;  %vm739_vm3 = vcmp.lt.s32.totalorder %v736_v40, 1 }
  0x2f   :  { %v915_v23 = vsel %vm796_vm1, %v1501_v21, 0  ;;  %v921_v24 = vsel %vm796_vm1, %v1657_v22, 0  ;;  %v1661_v28 = vld [vmem:[#allocation5 + $0x8] ss:$12 sps:$4 sm:$0xff]   ;;  %v1511_v29 = vcombine.high %v752_v26, %v752_v26  ;;  %v1510_v30 = vcombine.low %v752_v26, %v752_v26  ;;  %v1664_v31 = vld [vmem:[#allocation5 + $0x20] ss:$0 sps:$4 sm:$0xff]  }
  0x30   :  { %1546 = vmatpush3.bf16.msra.mxu1 %v804_v12  ;;  %809 = vmatpush1.bf16.msra.mxu0 %v798_v13  ;;  %v743_v16 = vsub.f32 %v740_v9, %v742_v14  ;;  %v1038_v34 = vsel %vm796_vm1, %v1664_v31, 0  ;;  %v1746_v38 = vmov 1983009808  }
  0x31   :  { %1551 = vmatprep.subr.bf16.mxu1 %v1743_v0  ;;  %923 = vmatprep.subr.bf16.mxu0 %v1653_v11  ;;  %v1032_v33 = vsel %vm796_vm1, %v1510_v30, 0  ;;  %v1388_v39 = vunpack.c.l.s4 %v1746_v38 }
  0x32   :  { %v1813_v19 = vpack.c.bf16 %v743_v16, %v743_v16 }
  0x33   :  { %v1389_v41 = vunpack.c.0.s8 %v1388_v39 }
  0x34   :  { %1548 = vmatmul.mubr.msk.bf16.vlgmr.msra.gmra.mrb[0].mxu1 %vm792_vm2, %v1813_v19  ;;  %1496 = vmatmul.mubr.msk.bf16.vlgmr.msra.gmra.mrb[0].mxu0 %vm792_vm2, %v1813_v19  ;;  %v745_v32 = vunpack.c.l.bf16 %v1813_v19 }
  0x35   :  { %924 = vmatpush1.bf16.msra.mxu0 %v1651_v17  ;;  %1552 = vmatpush3.bf16.msra.mxu1 %v1654_v18  ;;  %v1392_v45 = vsub.s32 %v1389_v41, %v736_v40 }
  0x36   :  { %1504 = vmatprep.subr.msk.bf16.mxu0 %vm796_vm1, %v1502_v20  ;;  %1553 = vmatprep.subr.bf16.mxu1 %v1743_v0  ;;  %v746_v35 = vsub.f32 %v743_v16, %v745_v32 }
  0x37   :  { %1555 = vmatprep.mubr.msk.bf16.mxu1 %vm1744_vm0, %v1743_v0  ;;  %955 = vmatprep.mubr.bf16.mxu0 %v1745_v1 }
  0x38   :  { %v747_v36 = vpack.c.bf16 %v746_v35, %v746_v35 }
  0x39   :  { %926 = vmatpush1.bf16.msra.mxu0 %v915_v23  ;;  %1554 = vmatpush3.bf16.msra.mxu1 %v921_v24 }
  0x3a   :  { %1040 = vmatprep.subr.bf16.mxu0 %v1660_v25  ;;  %1559 = vmatprep.subr.bf16.mxu1 %v1743_v0 }
  0x40   :  { %1556 = vmatmul.mubr.msk.bf16.vlgmr.msra.gmra.mrb[0].mxu1 %vm792_vm2, %v1805_v10  ;;  %1505 = vmatmul.mubr.msk.bf16.vlgmr.msra.gmra.mrb[0].mxu0 %vm792_vm2, %v1805_v10 }
  0x41   :  { %1041 = vmatpush1.bf16.msra.mxu0 %v1658_v27  ;;  %1560 = vmatpush3.bf16.msra.mxu1 %v1661_v28 }
  0x42   :  { %1513 = vmatprep.subr.msk.bf16.mxu0 %vm796_vm1, %v1511_v29  ;;  %1561 = vmatprep.subr.bf16.mxu1 %v1743_v0 }
  0x43   :  { %1563 = vmatprep.mubr.msk.bf16.mxu1 %vm1744_vm0, %v1743_v0  ;;  %1072 = vmatprep.mubr.bf16.mxu0 %v1745_v1 }
  0x45   :  { %1043 = vmatpush1.bf16.msra.mxu0 %v1032_v33  ;;  %1562 = vmatpush3.bf16.msra.mxu1 %v1038_v34 }
  0x46   :  { %1124 = vmatprep.subr.bf16.mxu0 %v1793_v2  ;;  %1567 = vmatprep.subr.bf16.mxu1 %v1743_v0 }
  0x4c   :  { %1564 = vmatmul.mubr.msk.bf16.vlgmr.msra.gmra.mrb[0].mxu1 %vm792_vm2, %v747_v36  ;;  %1514 = vmatmul.mubr.msk.bf16.vlgmr.msra.gmra.mrb[0].mxu0 %vm792_vm2, %v747_v36 }
  0x4d   :  { %1125 = vmatpush1.bf16.msra.mxu0 %v1798_v4  ;;  %1568 = vmatpush3.bf16.msra.mxu1 %v1795_v3 }
  0x4e   :  { %1516 = vmatprep.subr.msk.bf16.mxu0 %vm796_vm1, %v1801_v6  ;;  %1569 = vmatprep.subr.bf16.mxu1 %v1743_v0 }
  0x4f   :  { %1571 = vmatprep.mubr.msk.bf16.mxu1 %vm1744_vm0, %v1743_v0  ;;  %1156 = vmatprep.mubr.bf16.mxu0 %v1745_v1 }
  0x51   :  { %1127 = vmatpush1.bf16.msra.mxu0 %v798_v13  ;;  %1570 = vmatpush3.bf16.msra.mxu1 %v804_v12 }
  0x52   :  { %1208 = vmatprep.subr.bf16.mxu0 %v1660_v25  ;;  %1575 = vmatprep.subr.bf16.mxu1 %v1743_v0 }
  0x58   :  { %1572 = vmatmul.mubr.msk.bf16.vlgmr.msra.gmra.mrb[0].mxu1 %vm792_vm2, %v1805_v10  ;;  %1517 = vmatmul.mubr.msk.bf16.vlgmr.msra.gmra.mrb[0].mxu0 %vm792_vm2, %v1805_v10 }
  0x59   :  { %1209 = vmatpush1.bf16.msra.mxu0 %v1658_v27  ;;  %1576 = vmatpush3.bf16.msra.mxu1 %v1661_v28 }
  0x5a   :  { %1519 = vmatprep.subr.msk.bf16.mxu0 %vm796_vm1, %v1511_v29  ;;  %1577 = vmatprep.subr.bf16.mxu1 %v1743_v0 }
  0x5b   :  { %1579 = vmatprep.mubr.msk.bf16.mxu1 %vm1744_vm0, %v1743_v0  ;;  %1240 = vmatprep.mubr.bf16.mxu0 %v1745_v1 }
  0x5d   :  { %1211 = vmatpush1.bf16.msra.mxu0 %v1032_v33  ;;  %1578 = vmatpush3.bf16.msra.mxu1 %v1038_v34 }
  0x5e   :  { %1292 = vmatprep.subr.bf16.mxu0 %v1660_v25  ;;  %1583 = vmatprep.subr.bf16.mxu1 %v1743_v0 }
  0x64   :  { %1580 = vmatmul.mubr.msk.bf16.vlgmr.msra.gmra.mrb[0].mxu1 %vm792_vm2, %v1813_v19  ;;  %1520 = vmatmul.mubr.msk.bf16.vlgmr.msra.gmra.mrb[0].mxu0 %vm792_vm2, %v1813_v19 }
  0x65   :  { %1293 = vmatpush1.bf16.msra.mxu0 %v1658_v27  ;;  %1584 = vmatpush3.bf16.msra.mxu1 %v1661_v28 }
  0x66   :  { %1522 = vmatprep.subr.msk.bf16.mxu0 %vm796_vm1, %v1511_v29  ;;  %1585 = vmatprep.subr.bf16.mxu1 %v1743_v0 }
  0x67   :  { %1587 = vmatprep.mubr.msk.bf16.mxu1 %vm1744_vm0, %v1743_v0  ;;  %1324 = vmatprep.mubr.bf16.mxu0 %v1745_v1 }
  0x69   :  { %1295 = vmatpush1.bf16.msra.mxu0 %v1032_v33  ;;  %1586 = vmatpush3.bf16.msra.mxu1 %v1038_v34 }
  0x70   :  { %1588 = vmatmul.mubr.msk.bf16.vlgmr.msra.gmra.mrb[0].mxu1 %vm792_vm2, %v1805_v10  ;;  %1523 = vmatmul.mubr.msk.bf16.vlgmr.msra.gmra.mrb[0].mxu0 %vm792_vm2, %v1805_v10 }
 0x143   :  { %v1367_v42 = vpop.f32.mrb[0].mxu1  ;;  %v1326_v43 = vpop.f32.mrb[0].mxu0 }
 0x144   :  { %v1380_v44 = vsel %vm739_vm3, %v1367_v42, 0.0  ;;  %v1378_v46 = vsel %vm739_vm3, %v1326_v43, 0.0  ;;  %v1589_v47 = vpop.f32.mrb[1].mxu1  ;;  %v1328_v48 = vpop.f32.mrb[1].mxu0 }
 0x145   :  { %v1386_v49 = vcombine.high %v1380_v44, %v1380_v44  ;;  %v1379_v50 = vsel %vm739_vm3, %v1328_v48, 0.0  ;;  %v1370_v51 = vpop.f32.mrb[2].mxu1  ;;  %v1330_v52 = vpop.f32.mrb[2].mxu0  ;;  %v1407_v57 = vrot.slane %v1380_v44, %v1392_v45 }
 0x146   :  { %v1384_v53 = vcombine.low %v1378_v46, %v1379_v50  ;;  %v1385_v54 = vcombine.high %v1378_v46, %v1379_v50  ;;  %v1590_v55 = vpop.f32.mrb[3].mxu1  ;;  %v1331_v56 = vpop.f32.mrb[3].mxu0 }
 0x147   :  { %v1414_v58 = vrot.slane %v1386_v49, %v1392_v45 }
 0x148   :  { %v1393_v59 = vrot.slane %v1384_v53, %v1392_v45  ;;  %v1400_v60 = vrot.slane %v1385_v54, %v1392_v45 }
 0x14a   :  { %v1415_v61 = vcombine.low %v1393_v59, %v1407_v57  ;;  %v1416_v62 = vcombine.high %v1393_v59, %v1407_v57  ;;  %v1417_v63 = vcombine.low %v1400_v60, %v1414_v58  ;;  %v1418_v0 = vcombine.high %v1400_v60, %v1414_v58 }
 0x14c   :  { %1423 = vst [vmem:[#allocation7] sm:$0x3f] %v1415_v61  ;;  %1424 = vst [vmem:[#allocation7 + $0x6] sm:$0x3f] %v1416_v62 }
 0x14d   :  { %1425 = vst [vmem:[#allocation7 + $0xc] sm:$0x3f] %v1417_v63  ;;  %1426 = vst [vmem:[#allocation7 + $0x12] sm:$0x3f] %v1418_v0 }
 0x14e   :  { %1439 = vsyncadd [#allocation4], 288  ;;  %s1747_s1 = smov [#allocation7]  }
 0x14f   :  { %s1440_s9 = sshll.u32 %s1747_s1, 4  ;;  %s1441_s9 = int_to_ptr.vmem [resolvable:$true] %s1440_s9 }
 0x150   :  { %s1709_s10 = scalar_lea.vmem %s1441_s9, 96  ;;  %s1713_s11 = scalar_lea.vmem %s1441_s9, 384 }
 0x151   :  { %p1710_p2 = scmp.ne.s32.totalorder %s1441_s9, %s1709_s10  ;;  %p1714_p3 = scmp.lt.s32.totalorder %s1441_s9, %s1441_s9 }
 0x152   :  { %p1715_p4 = scmp.lt.s32.totalorder %s1713_s11, %s1709_s10 }
 0x154   :  { %p1716_p5 = por %p1715_p4, %p1714_p3 }
 0x156   :  { %p1717_p6 = pnand %p1716_p5, %p1710_p2 }
 0x158   :  { %1720 = shalt.err (!%p1717_p6)
}
 0x159   :  { %s1721_s14 = scalar_lea.hbm %s1889_s2, 96 }
 0x15a   :  { %p1722_p7 = scmp.ne.s32.totalorder %s1889_s2, %s1721_s14  ;;  %p1725_p8 = scmp.lt.u32.totalorder %s1721_s14, %s1889_s2 }
 0x15c   :  { %p1727_p9 = pnand %p1725_p8, %p1722_p7 }
 0x15e   :  { %1730 = shalt.err (!%p1727_p9)
}
 0x15f   :  { %s1748_s19 = smov 96   ;;  %s1749_s20 = smov 6  }
 0x160   :  { %1446 = dma.vmem_to_hbm [thread:$0]  %s1441_s9, 96, %s1889_s2, [#allocation4], %s1748_s19, %s1748_s19, %s1749_s20  }
 0x161   :  { %1735 = dma.done.wait [#allocation4], 384  }
 0x162   :  { %1736 = vsyncadd [#allocation4], 4294966912 }
 0x163   :  { %1450 = vsyncpa [#allocation3], 1 }
 0x164   :  { %1451 = vsyncpa [#allocation6], 1 }
 0x165   :  { %1452 = vsyncpa [#allocation4], 1 }

</bundles_post_ra>
